<compile_context>
chip_gen: v6e
topology: v6e:2x2x1
jax: 0.10.0
libtpu: 0.0.40
codegen_flags: <defaults>
</compile_context>

<pallas_src>
import functools
import math

import jax
import jax.numpy as jnp
from jax.experimental import pallas as pl
from jax.experimental.pallas import tpu as pltpu

LOG_2PI = math.log(2.0 * math.pi)
LANES = 128  # vreg / MXU lane width


def _round_up(x, m):
    return ((x + m - 1) // m) * m


# ----------------------------------------------------------------------------- kernel
def _policy_kernel(x_ref, w1_ref, w2_ref, w3_ref, b1_ref, b2_ref, b3_ref, out_ref, *, num_actions):
    A = num_actions
    OUT_W = out_ref.shape[-1]

    x = x_ref[...]                                                          # (tb, NIp) bf16

    # layer 1: fused [critic-l1 | actor-l1]  -> one lane-full bf16 matmul (f32 acc) + one tanh
    h = jnp.tanh(jnp.dot(x, w1_ref[...],
                         preferred_element_type=jnp.float32) + b1_ref[...])
    # layer 2: block-diagonal [wc2 0; 0 wa2]
    h = jnp.tanh(jnp.dot(h.astype(jnp.bfloat16), w2_ref[...],
                         preferred_element_type=jnp.float32) + b2_ref[...])
    # fused heads: col 0 = value, cols 1..A = mean, cols 1+A..1+2A = logstd (exp done in wrapper)
    z = jnp.dot(h.astype(jnp.bfloat16), w3_ref[...],
                preferred_element_type=jnp.float32) + b3_ref[...]           # (tb, OUT_W) f32

    # (1, OUT_W) lane masks; broadcasting handles the batch rows (no full-tile iota filler).
    col = jax.lax.broadcasted_iota(jnp.int32, (1, OUT_W), 1)
    is_std = jnp.logical_and(col >= 1 + A, col < 1 + 2 * A)
    is_logp = col == 1 + 2 * A

    # one XLU lane reduction of logstd feeds log_prob (entropy is derived from it in the wrapper)
    rowsum = jnp.sum(jnp.where(is_std, z, 0.0), axis=-1, keepdims=True)     # (tb, 1)
    slab = jnp.where(is_logp, -rowsum - 0.5 * A * LOG_2PI, z)               # value/mean/logstd pass through
    out_ref[...] = slab                                                     # single full-block store


# ----------------------------------------------------------------------------- host-side packing
def pack_params(params):
    """Pack the 14 PyTorch-style parameters into 3 bf16 weight blocks + 3 f32 bias rows, host-side."""
    NI, H = params["wc1"].shape
    A = params["wm"].shape[1]
    H2 = 2 * H
    assert H2 == LANES, "packing assumes hidden_size == 64 so 2*H fills the 128-lane width"
    OUT_W = max(32, _round_up(2 * A + 2, 32))   # value | mean(A) | logstd(A) | logp | pad
    NIp = _round_up(NI, 8)                      # sublane-aligned input feature count

    w1 = jnp.zeros((NIp, H2), jnp.float32)
    w1 = w1.at[:NI, :H].set(params["wc1"]).at[:NI, H:].set(params["wa1"])   # [critic-l1 | actor-l1]
    w2 = jnp.zeros((H2, H2), jnp.float32)
    w2 = w2.at[:H, :H].set(params["wc2"]).at[H:, H:].set(params["wa2"])     # block-diagonal
    w3 = jnp.zeros((H2, OUT_W), jnp.float32)
    w3 = w3.at[:H, 0:1].set(params["wc3"])
    w3 = w3.at[H:, 1:1 + A].set(params["wm"])
    w3 = w3.at[H:, 1 + A:1 + 2 * A].set(params["wls"])

    b1 = jnp.concatenate([params["bc1"], params["ba1"]], axis=1)            # (1, 128)
    b2 = jnp.concatenate([params["bc2"], params["ba2"]], axis=1)            # (1, 128)
    b3 = jnp.zeros((1, OUT_W), jnp.float32)
    b3 = b3.at[:, 0:1].set(params["bc3"])
    b3 = b3.at[:, 1:1 + A].set(params["bm"])
    b3 = b3.at[:, 1 + A:1 + 2 * A].set(params["bls"])

    weights = tuple(w.astype(jnp.bfloat16) for w in (w1, w2, w3))           # bf16 MXU operands
    biases = (b1.astype(jnp.float32), b2.astype(jnp.float32), b3.astype(jnp.float32))
    dims = dict(num_inputs=int(NI), num_inputs_padded=int(NIp), hidden=int(H),
                num_actions=int(A), out_width=int(OUT_W))
    return weights, biases, dims


# ----------------------------------------------------------------------------- wrapper
def split_policy_act(x, packed, *, tile_b=2048):
    """Fused SplitPolicy.act(deterministic=True). Returns (value, action, log_probs, std, entropy)."""
    (w1, w2, w3), (b1, b2, b3), dims = packed
    NI, NIp = dims["num_inputs"], dims["num_inputs_padded"]
    A, OUT_W = dims["num_actions"], dims["out_width"]
    H2 = w2.shape[0]

    B = x.shape[0]
    x = x.astype(jnp.bfloat16)
    if NIp != NI:
        x = jnp.pad(x, ((0, 0), (0, NIp - NI)))

    # Batch tiling: >=8 sublanes, large tiles (low per-step overhead), and at least 2 "parallel"
    # tiles when the batch allows it so v7x's two TensorCores both get work.
    B8 = _round_up(max(B, 8), 8)
    tb = min(_round_up(tile_b, 8), B8)
    if B8 // tb < 2 and B8 >= 16:
        tb = _round_up(pl.cdiv(B8, 2), 8)
    Bp = _round_up(B, tb)
    if Bp != B:
        x = jnp.pad(x, ((0, Bp - B), (0, 0)))   # padded rows are sliced off before the entropy mean

    cost = pl.CostEstimate(
        flops=2 * Bp * (NIp * H2 + H2 * H2 + H2 * OUT_W),
        transcendentals=2 * Bp * H2,            # two tanh passes (exp is done in the wrapper)
        bytes_accessed=Bp * NIp * 2 + Bp * OUT_W * 4
        + 2 * (w1.size + w2.size + w3.size) + 4 * (b1.size + b2.size + b3.size),
    )

    kernel = functools.partial(_policy_kernel, num_actions=A)
    out = pl.pallas_call(
        kernel,
        out_shape=jax.ShapeDtypeStruct((Bp, OUT_W), jnp.float32),
        grid_spec=pltpu.PrefetchScalarGridSpec(
            num_scalar_prefetch=0,
            grid=(Bp // tb,),
            in_specs=[
                pl.BlockSpec((tb, NIp), lambda i: (i, 0)),      # batch tile of x (bf16)
                pl.BlockSpec(w1.shape, lambda i: (0, 0)),       # resident, aligned weight blocks
                pl.BlockSpec(w2.shape, lambda i: (0, 0)),
                pl.BlockSpec(w3.shape, lambda i: (0, 0)),
                pl.BlockSpec(b1.shape, lambda i: (0, 0)),       # resident bias rows (f32)
                pl.BlockSpec(b2.shape, lambda i: (0, 0)),
                pl.BlockSpec(b3.shape, lambda i: (0, 0)),
            ],
            out_specs=pl.BlockSpec((tb, OUT_W), lambda i: (i, 0)),
        ),
        compiler_params=pltpu.CompilerParams(
            dimension_semantics=("parallel",)),                 # v7x: 2 TCs split batch tiles
        cost_estimate=cost,
    )(x, w1, w2, w3, b1, b2, b3)

    out = out[:B]
    value = out[:, 0:1]
    action = out[:, 1:1 + A]                    # deterministic action = mean
    logstd = out[:, 1 + A:1 + 2 * A]
    logp = out[:, 1 + 2 * A:2 + 2 * A]
    std = jnp.exp(logstd)                       # exp moved out of the kernel (EUP relief)
    dist_entropy = jnp.mean(0.5 * A - logp)     # entropy row = 0.5*A - logp (algebraic identity)
    return value, action, logp, std, dist_entropy


# ----------------------------------------------------------------------------- params / reference
def init_params(key, num_inputs, num_actions, hidden_size=64):
    """Synthetic parameters mirroring the module's init: orthogonal weights, constant biases."""
    def ortho(k, in_f, out_f, gain):
        return jax.nn.initializers.orthogonal(scale=gain)(k, (in_f, out_f), jnp.float32)

    ks = jax.random.split(key, 8)
    g = math.sqrt(2.0)
    H = hidden_size
    return {
        # critic_full
        "wc1": ortho(ks[0], num_inputs, H, g), "bc1": jnp.zeros((1, H), jnp.float32),
        "wc2": ortho(ks[1], H, H, g),          "bc2": jnp.zeros((1, H), jnp.float32),
        "wc3": ortho(ks[2], H, 1, 1.0),        "bc3": jnp.zeros((1, 1), jnp.float32),
        # actor_actuator
        "wa1": ortho(ks[3], num_inputs, H, g), "ba1": jnp.zeros((1, H), jnp.float32),
        "wa2": ortho(ks[4], H, H, g),          "ba2": jnp.zeros((1, H), jnp.float32),
        # dist heads
        "wm":  ortho(ks[5], H, num_actions, 0.02), "bm":  jnp.zeros((1, num_actions), jnp.float32),
        "wls": ortho(ks[6], H, num_actions, 1.0),  "bls": jnp.full((1, num_actions), -0.5, jnp.float32),
    }


def _reference(x, p):
    """Pure f32 reference of the original module math (kernel uses bf16 MXU operands)."""
    h = jnp.tanh(x @ p["wc1"] + p["bc1"])
    h = jnp.tanh(h @ p["wc2"] + p["bc2"])
    value = h @ p["wc3"] + p["bc3"]
    a = jnp.tanh(x @ p["wa1"] + p["ba1"])
    a = jnp.tanh(a @ p["wa2"] + p["ba2"])
    mean = a @ p["wm"] + p["bm"]
    logstd = a @ p["wls"] + p["bls"]
    logp = jnp.sum(-logstd - 0.5 * LOG_2PI, axis=-1, keepdims=True)
    ent = jnp.mean(jnp.sum(0.5 + 0.5 * LOG_2PI + logstd, axis=-1))
    return value, mean, logp, jnp.exp(logstd), ent


if __name__ == "__main__":
    B, NUM_INPUTS, NUM_ACTIONS, HIDDEN = 8, 32, 8, 64

    key = jax.random.PRNGKey(0)
    kx, kp = jax.random.split(key)
    x = jax.random.normal(kx, (B, NUM_INPUTS), jnp.float32)
    params = init_params(kp, NUM_INPUTS, NUM_ACTIONS, HIDDEN)
    packed = pack_params(params)   # pack weights/biases once, host-side (bf16 weight blocks)

    value, action, action_log_probs, action_std, dist_entropy = jax.block_until_ready(
        split_policy_act(x, packed))

    # correctness check against a pure-JAX f32 reference (tolerance loosened for bf16 MXU operands)
    rv, rm, rlp, rstd, rent = _reference(x, params)
    assert jnp.allclose(value, rv, atol=1e-1, rtol=1e-1)
    assert jnp.allclose(action, rm, atol=1e-1, rtol=1e-1)
    assert jnp.allclose(action_log_probs, rlp, atol=1e-1, rtol=1e-1)
    assert jnp.allclose(action_std, rstd, atol=1e-1, rtol=1e-1)
    assert jnp.allclose(dist_entropy, rent, atol=1e-1, rtol=1e-1)

    print("KERNEL_OK")
</pallas_src>

<mosaic_0001>
module attributes {stable_mosaic.version = 11 : i64} {
  func.func @_policy_kernel(%arg0: i32, %arg1: memref<8x32xbf16, #tpu.memory_space<vmem>>, %arg2: memref<32x128xbf16, #tpu.memory_space<vmem>>, %arg3: memref<128x128xbf16, #tpu.memory_space<vmem>>, %arg4: memref<128x32xbf16, #tpu.memory_space<vmem>>, %arg5: memref<1x128xf32, #tpu.memory_space<vmem>>, %arg6: memref<1x128xf32, #tpu.memory_space<vmem>>, %arg7: memref<1x32xf32, #tpu.memory_space<vmem>>, %arg8: memref<8x32xf32, #tpu.memory_space<vmem>>) attributes {dimension_semantics = [#tpu.dimension_semantics<parallel>], iteration_bounds = array<i64: 1>, scalar_prefetch = 0 : i64, scratch_operands = 0 : i64, tpu.core_type = #tpu.core_type<tc>, window_params = [{transform_indices = @transform_0, window_bounds = array<i64: 8, 32>}, {pipeline_mode = #tpu.pipeline_mode<synchronous>, transform_indices = @transform_1, window_bounds = array<i64: 32, 128>}, {pipeline_mode = #tpu.pipeline_mode<synchronous>, transform_indices = @transform_2, window_bounds = array<i64: 128, 128>}, {pipeline_mode = #tpu.pipeline_mode<synchronous>, transform_indices = @transform_3, window_bounds = array<i64: 128, 32>}, {pipeline_mode = #tpu.pipeline_mode<synchronous>, transform_indices = @transform_4, window_bounds = array<i64: 1, 128>}, {pipeline_mode = #tpu.pipeline_mode<synchronous>, transform_indices = @transform_5, window_bounds = array<i64: 1, 128>}, {pipeline_mode = #tpu.pipeline_mode<synchronous>, transform_indices = @transform_6, window_bounds = array<i64: 1, 32>}, {transform_indices = @transform_7, window_bounds = array<i64: 8, 32>}]} {
    %c0 = arith.constant 0 : index
    %c0_0 = arith.constant 0 : index
    %0 = vector.load %arg1[%c0, %c0_0] : memref<8x32xbf16, #tpu.memory_space<vmem>>, vector<8x32xbf16>
    %c0_1 = arith.constant 0 : index
    %c0_2 = arith.constant 0 : index
    %1 = vector.load %arg2[%c0_1, %c0_2] : memref<32x128xbf16, #tpu.memory_space<vmem>>, vector<32x128xbf16>
    %cst = arith.constant dense<0.000000e+00> : vector<8x128xf32>
    %2 = tpu.matmul %0, %1, %cst {dimension_numbers = #tpu.dot_dimension_numbers<[1], [0], [0], [1], [0, 0, 1, 1], [], []>} : vector<8x32xbf16>, vector<32x128xbf16>, vector<8x128xf32> -> vector<8x128xf32>
    %c0_3 = arith.constant 0 : index
    %c0_4 = arith.constant 0 : index
    %3 = vector.load %arg5[%c0_3, %c0_4] : memref<1x128xf32, #tpu.memory_space<vmem>>, vector<1x128xf32>
    %4 = vector.broadcast %3 : vector<1x128xf32> to vector<8x128xf32>
    %5 = arith.addf %2, %4 : vector<8x128xf32>
    %6 = math.tanh %5 : vector<8x128xf32>
    %7 = arith.truncf %6 : vector<8x128xf32> to vector<8x128xbf16>
    %c0_5 = arith.constant 0 : index
    %c0_6 = arith.constant 0 : index
    %8 = vector.load %arg3[%c0_5, %c0_6] : memref<128x128xbf16, #tpu.memory_space<vmem>>, vector<128x128xbf16>
    %cst_7 = arith.constant dense<0.000000e+00> : vector<8x128xf32>
    %9 = tpu.matmul %7, %8, %cst_7 {dimension_numbers = #tpu.dot_dimension_numbers<[1], [0], [0], [1], [0, 0, 1, 1], [], []>} : vector<8x128xbf16>, vector<128x128xbf16>, vector<8x128xf32> -> vector<8x128xf32>
    %c0_8 = arith.constant 0 : index
    %c0_9 = arith.constant 0 : index
    %10 = vector.load %arg6[%c0_8, %c0_9] : memref<1x128xf32, #tpu.memory_space<vmem>>, vector<1x128xf32>
    %11 = vector.broadcast %10 : vector<1x128xf32> to vector<8x128xf32>
    %12 = arith.addf %9, %11 : vector<8x128xf32>
    %13 = math.tanh %12 : vector<8x128xf32>
    %14 = arith.truncf %13 : vector<8x128xf32> to vector<8x128xbf16>
    %c0_10 = arith.constant 0 : index
    %c0_11 = arith.constant 0 : index
    %15 = vector.load %arg4[%c0_10, %c0_11] : memref<128x32xbf16, #tpu.memory_space<vmem>>, vector<128x32xbf16>
    %cst_12 = arith.constant dense<0.000000e+00> : vector<8x32xf32>
    %16 = tpu.matmul %14, %15, %cst_12 {dimension_numbers = #tpu.dot_dimension_numbers<[1], [0], [0], [1], [0, 0, 1, 1], [], []>} : vector<8x128xbf16>, vector<128x32xbf16>, vector<8x32xf32> -> vector<8x32xf32>
    %c0_13 = arith.constant 0 : index
    %c0_14 = arith.constant 0 : index
    %17 = vector.load %arg7[%c0_13, %c0_14] : memref<1x32xf32, #tpu.memory_space<vmem>>, vector<1x32xf32>
    %18 = vector.broadcast %17 : vector<1x32xf32> to vector<8x32xf32>
    %19 = arith.addf %16, %18 : vector<8x32xf32>
    %20 = tpu.iota {dimensions = array<i32: 1>} : vector<1x32xi32>
    %c9_i32 = arith.constant 9 : i32
    %21 = vector.broadcast %c9_i32 : i32 to vector<1x32xi32>
    %22 = arith.cmpi sge, %20, %21 : vector<1x32xi32>
    %c17_i32 = arith.constant 17 : i32
    %23 = vector.broadcast %c17_i32 : i32 to vector<1x32xi32>
    %24 = arith.cmpi slt, %20, %23 : vector<1x32xi32>
    %25 = arith.andi %22, %24 : vector<1x32xi1>
    %c17_i32_15 = arith.constant 17 : i32
    %26 = vector.broadcast %c17_i32_15 : i32 to vector<1x32xi32>
    %27 = arith.cmpi eq, %20, %26 : vector<1x32xi32>
    %cst_16 = arith.constant 0.000000e+00 : f32
    %28 = vector.shape_cast %25 : vector<1x32xi1> to vector<1x32xi1>
    %29 = vector.broadcast %28 : vector<1x32xi1> to vector<8x32xi1>
    %30 = vector.broadcast %cst_16 : f32 to vector<8x32xf32>
    %31 = arith.select %29, %19, %30 : vector<8x32xi1>, vector<8x32xf32>
    %cst_17 = arith.constant dense<0.000000e+00> : vector<8xf32>
    %32 = vector.multi_reduction <add>, %31, %cst_17 [1] : vector<8x32xf32> to vector<8xf32>
    %33 = vector.shape_cast %32 : vector<8xf32> to vector<8x1xf32>
    %cst_18 = arith.constant 0.000000e+00 : f32
    %34 = vector.broadcast %cst_18 : f32 to vector<8x1xf32>
    %35 = arith.subf %34, %33 : vector<8x1xf32>
    %cst_19 = arith.constant 7.35150814 : f32
    %36 = vector.broadcast %cst_19 : f32 to vector<8x1xf32>
    %37 = arith.subf %35, %36 : vector<8x1xf32>
    %38 = vector.shape_cast %27 : vector<1x32xi1> to vector<1x32xi1>
    %39 = vector.broadcast %38 : vector<1x32xi1> to vector<8x32xi1>
    %40 = vector.shape_cast %37 : vector<8x1xf32> to vector<8x1xf32>
    %41 = vector.broadcast %40 : vector<8x1xf32> to vector<8x32xf32>
    %42 = arith.select %39, %41, %19 : vector<8x32xi1>, vector<8x32xf32>
    %c0_20 = arith.constant 0 : index
    %c0_21 = arith.constant 0 : index
    %43 = vector.load %arg8[%c0_20, %c0_21] : memref<8x32xf32, #tpu.memory_space<vmem>>, vector<8x32xf32>
    tpu.vector_store %arg8[%c0_20, %c0_21], %42 {strides = array<i32>} : memref<8x32xf32, #tpu.memory_space<vmem>>, vector<8x32xf32>,
    return
  }
  func.func @transform_0(%arg0: i32) -> (i32, i32) {
    %c0_i32 = arith.constant 0 : i32
    %c0_i32_0 = arith.constant 0 : i32
    return %arg0, %c0_i32 : i32, i32
  }
  func.func @transform_1(%arg0: i32) -> (i32, i32) {
    %c0_i32 = arith.constant 0 : i32
    %c0_i32_0 = arith.constant 0 : i32
    %c0_i32_1 = arith.constant 0 : i32
    return %c0_i32, %c0_i32_0 : i32, i32
  }
  func.func @transform_2(%arg0: i32) -> (i32, i32) {
    %c0_i32 = arith.constant 0 : i32
    %c0_i32_0 = arith.constant 0 : i32
    %c0_i32_1 = arith.constant 0 : i32
    return %c0_i32, %c0_i32_0 : i32, i32
  }
  func.func @transform_3(%arg0: i32) -> (i32, i32) {
    %c0_i32 = arith.constant 0 : i32
    %c0_i32_0 = arith.constant 0 : i32
    %c0_i32_1 = arith.constant 0 : i32
    return %c0_i32, %c0_i32_0 : i32, i32
  }
  func.func @transform_4(%arg0: i32) -> (i32, i32) {
    %c0_i32 = arith.constant 0 : i32
    %c0_i32_0 = arith.constant 0 : i32
    %c0_i32_1 = arith.constant 0 : i32
    return %c0_i32, %c0_i32_0 : i32, i32
  }
  func.func @transform_5(%arg0: i32) -> (i32, i32) {
    %c0_i32 = arith.constant 0 : i32
    %c0_i32_0 = arith.constant 0 : i32
    %c0_i32_1 = arith.constant 0 : i32
    return %c0_i32, %c0_i32_0 : i32, i32
  }
  func.func @transform_6(%arg0: i32) -> (i32, i32) {
    %c0_i32 = arith.constant 0 : i32
    %c0_i32_0 = arith.constant 0 : i32
    %c0_i32_1 = arith.constant 0 : i32
    return %c0_i32, %c0_i32_0 : i32, i32
  }
  func.func @transform_7(%arg0: i32) -> (i32, i32) {
    %c0_i32 = arith.constant 0 : i32
    %c0_i32_0 = arith.constant 0 : i32
    return %arg0, %c0_i32 : i32, i32
  }
}

</mosaic_0001>

<bundles_post_ra>
// kernel: tpu_custom_call.1
= control target key start
LH: loop header
LB: loop body
LE: loop exit
PB: predicated region body
PF: predicated region fallthrough
CT: control target
= control target key end

     0   :  { %12 = vsyncpa [#allocation3], 0  ;;  %s669_s0 = inlined_call_operand.hbm [shape: bf16[8,32], index: 0, kind: input, shape index: {}]   ;;  %s670_s1 = inlined_call_operand.vmem [shape: bf16[32,128], index: 1, kind: input, shape index: {}]   ;;  %s671_s2 = inlined_call_operand.vmem [shape: bf16[128,128], index: 2, kind: input, shape index: {}]   ;;  %s672_s3 = inlined_call_operand.vmem [shape: bf16[128,32], index: 3, kind: input, shape index: {}]   ;;  %s673_s4 = inlined_call_operand.vmem [shape: f32[1,128], index: 4, kind: input, shape index: {}]   ;;  %s674_s5 = inlined_call_operand.vmem [shape: f32[1,128], index: 5, kind: input, shape index: {}]   ;;  %s675_s6 = inlined_call_operand.vmem [shape: f32[1,32], index: 6, kind: input, shape index: {}]   ;;  %s676_s7 = inlined_call_operand.hbm [shape: f32[8,32], index: 7, kind: output, shape index: {}]  }
   0x1   :  { %13 = vsyncpa [#allocation4], 0  ;;  %s529_s24 = smov [#allocation2]  }
   0x2   :  { %s20_s25 = sshll.u32 %s529_s24, 4  ;;  %s21_s25 = int_to_ptr.vmem [resolvable:$true] %s20_s25 }
   0x3   :  { %s493_s26 = scalar_lea.vmem %s21_s25, 64  ;;  %p498_p1 = scmp.lt.s32.totalorder %s21_s25, %s21_s25 }
   0x4   :  { %p494_p0 = scmp.ne.s32.totalorder %s21_s25, %s493_s26  ;;  %p499_p2 = scmp.lt.s32.totalorder %s493_s26, %s493_s26 }
   0x6   :  { %p500_p3 = por %p499_p2, %p498_p1 }
   0x8   :  { %p501_p4 = pnand %p500_p3, %p494_p0 }
   0xa   :  { %504 = shalt.err (!%p501_p4)
}
   0xb   :  { %23 = dma.hbm_to_vmem [thread:$0]  %s669_s0, 64, %s21_s25, [#allocation3]  }
   0xc   :  { %525 = dma.done.wait [#allocation3], 64  }
   0xd   :  { %526 = vsyncadd [#allocation3], 4294967232  ;;  %v530_v0 = vmov 0.0   ;;  %vm531_vm0 = vmmov 0   ;;  %v463_v1 = vld [vmem:[%s670_s1 + $0x8] sm:$0xff]   ;;  %v464_v2 = vld [vmem:[%s670_s1] sm:$0xff]   ;;  %v334_v36 = vlaneseq }
   0xe   :  { %411 = vmatprep.subr.bf16.mxu0 %v530_v0  ;;  %415 = vmatprep.mubr.msk.bf16.mxu0 %vm531_vm0, %v530_v0  ;;  %v465_v3 = vld [vmem:[%s671_s2 + $0x38] sm:$0xff]   ;;  %v40_v4 = vld [vmem:[#allocation2] sm:$0xf]  ;;  %vm64_vm1 = vcmask 261120   ;;  %v466_v5 = vld [vmem:[%s671_s2 + $0x30] sm:$0xff]  }
   0xf   :  { %419 = vmatprep.subr.bf16.mxu1 %v530_v0  ;;  %435 = vmatprep.mubr.msk.bf16.mxu1 %vm531_vm0, %v530_v0  ;;  %v467_v6 = vld [vmem:[%s671_s2 + $0x28] sm:$0xff]   ;;  %v468_v7 = vld [vmem:[%s671_s2 + $0x20] sm:$0xff]   ;;  %v469_v8 = vld [vmem:[%s671_s2 + $0x18] sm:$0xff]   ;;  %v335_v37 = vand.u32 127, %v334_v36 }
  0x10   :  { %412 = vmatpush3.bf16.msra.mxu0 %v463_v1  ;;  %420 = vmatpush3.bf16.msra.mxu1 %v465_v3  ;;  %v470_v9 = vld [vmem:[%s671_s2 + $0x10] sm:$0xff]   ;;  %v471_v10 = vld [vmem:[%s671_s2 + $0x8] sm:$0xff]   ;;  %v472_v11 = vld [vmem:[%s671_s2] sm:$0xff]  }
  0x11   :  { %413 = vmatprep.subr.bf16.mxu0 %v530_v0  ;;  %421 = vmatprep.subr.bf16.mxu1 %v530_v0  ;;  %v473_v12 = vld [vmem:[%s672_s3 + $0x38] sm:$0xff]   ;;  %v474_v13 = vld [vmem:[%s672_s3 + $0x30] sm:$0xff]   ;;  %v475_v14 = vld [vmem:[%s672_s3 + $0x28] sm:$0xff]   ;;  %vm336_vm2 = vcmp.ge.s32.totalorder %v335_v37, 9  ;;  %vm337_vm3 = vcmp.lt.s32.totalorder %v335_v37, 17  ;;  %vm339_vm5 = vcmp.eq.s32.totalorder %v335_v37, 17 }
  0x12   :  { %v367_v15 = vld [vmem:[%s673_s4] ss:$0 sm:$0xff]  ;;  %v477_v24 = vld [vmem:[%s672_s3 + $0x18] sm:$0xff]   ;;  %v478_v25 = vld [vmem:[%s672_s3 + $0x10] sm:$0xff]  }
  0x13   :  { %v476_v23 = vld [vmem:[%s672_s3 + $0x20] sm:$0xff]   ;;  %v479_v26 = vld [vmem:[%s672_s3 + $0x8] sm:$0xff]   ;;  %vm338_vm4 = vmand %vm336_vm2, %vm337_vm3 }
  0x14   :  { %414 = vmatpush3.bf16.msra.mxu0 %v464_v2  ;;  %422 = vmatpush3.bf16.msra.mxu1 %v466_v5  ;;  %v480_v27 = vld [vmem:[%s672_s3] sm:$0xff]  }
  0x15   :  { %439 = vmatprep.subr.bf16.mxu0 %v530_v0  ;;  %423 = vmatprep.subr.bf16.mxu1 %v530_v0  ;;  %v371_v28 = vld [vmem:[%s674_s5] ss:$0 sm:$0xff]  ;;  %s532_s5 = smov [#allocation5]  }
  0x16   :  { %v380_v38 = vld [vmem:[%s675_s6] ss:$0 sm:$0xff]  ;;  %s358_s18 = sshll.u32 %s532_s5, 4  ;;  %s359_s18 = int_to_ptr.vmem [resolvable:$true] %s358_s18 }
  0x17   :  { %416 = vmatmul.mubr.msk.bf16.vlgmr.msra.gmra.mxu0 %vm64_vm1, %v40_v4  ;;  %s505_s6 = scalar_lea.vmem %s359_s18, 128  ;;  %p510_p6 = scmp.lt.s32.totalorder %s359_s18, %s359_s18 }
  0x18   :  { %455 = vmatprep.mubr.msk.bf16.mxu0 %vm531_vm0, %v530_v0  ;;  %424 = vmatpush3.bf16.msra.mxu1 %v467_v6  ;;  %p506_p5 = scmp.ne.s32.totalorder %s359_s18, %s505_s6  ;;  %p511_p7 = scmp.lt.s32.totalorder %s505_s6, %s505_s6 }
  0x19   :  { %425 = vmatprep.subr.bf16.mxu1 %v530_v0  ;;  %440 = vmatpush3.bf16.msra.mxu0 %v473_v12 }
  0x1a   :  { %441 = vmatprep.subr.bf16.mxu0 %v530_v0  ;;  %p512_p8 = por %p511_p7, %p510_p6 }
  0x1c   :  { %426 = vmatpush3.bf16.msra.mxu1 %v468_v7  ;;  %p513_p9 = pnand %p512_p8, %p506_p5 }
  0x1d   :  { %427 = vmatprep.subr.bf16.mxu1 %v530_v0  ;;  %442 = vmatpush3.bf16.msra.mxu0 %v474_v13 }
  0x1e   :  { %443 = vmatprep.subr.bf16.mxu0 %v530_v0 }
  0x20   :  { %428 = vmatpush3.bf16.msra.mxu1 %v469_v8 }
  0x21   :  { %429 = vmatprep.subr.bf16.mxu1 %v530_v0  ;;  %444 = vmatpush3.bf16.msra.mxu0 %v475_v14 }
  0x22   :  { %445 = vmatprep.subr.bf16.mxu0 %v530_v0 }
  0x24   :  { %430 = vmatpush3.bf16.msra.mxu1 %v470_v9 }
  0x25   :  { %431 = vmatprep.subr.bf16.mxu1 %v530_v0  ;;  %446 = vmatpush3.bf16.msra.mxu0 %v476_v23 }
  0x26   :  { %447 = vmatprep.subr.bf16.mxu0 %v530_v0 }
  0x28   :  { %432 = vmatpush3.bf16.msra.mxu1 %v471_v10 }
  0x29   :  { %433 = vmatprep.subr.bf16.mxu1 %v530_v0  ;;  %448 = vmatpush3.bf16.msra.mxu0 %v477_v24 }
  0x2a   :  { %449 = vmatprep.subr.bf16.mxu0 %v530_v0 }
  0x2c   :  { %434 = vmatpush3.bf16.msra.mxu1 %v472_v11 }
  0x2d   :  { %450 = vmatpush3.bf16.msra.mxu0 %v478_v25 }
  0x2e   :  { %451 = vmatprep.subr.bf16.mxu0 %v530_v0 }
  0x31   :  { %452 = vmatpush3.bf16.msra.mxu0 %v479_v26 }
  0x32   :  { %453 = vmatprep.subr.bf16.mxu0 %v530_v0 }
  0x35   :  { %454 = vmatpush3.bf16.msra.mxu0 %v480_v27 }
  0xd7   :  { %v102_v16 = vpop.f32.mrf.mxu0 }
  0xd8   :  { %v103_v17 = vadd.f32 %v367_v15, %v102_v16 }
  0xd9   :  { %v417_v18 = vpop.f32.mrf.mxu0 }
  0xda   :  { %481 = vtanh.f32 %v103_v17 }
  0xdb   :  { %v105_v19 = vpop.f32.mrf.mxu0 }
  0xdd   :  { %v418_v20 = vpop.f32.mrf.mxu0 }
  0xe7   :  { %v482_v21 = vpop.eup %481 }
  0xe8   :  { %v109_v22 = vpack.c.bf16 %v482_v21, %v482_v21 }
  0xea   :  { %436 = vmatmul.mubr.bf16.vlgmr.msra.gmra.mxu1 %v109_v22 }
 0x1aa   :  { %v215_v29 = vpop.f32.mrf.mxu1 }
 0x1ab   :  { %v216_v30 = vadd.f32 %v371_v28, %v215_v29 }
 0x1ac   :  { %v437_v31 = vpop.f32.mrf.mxu1 }
 0x1ad   :  { %483 = vtanh.f32 %v216_v30 }
 0x1ae   :  { %v218_v32 = vpop.f32.mrf.mxu1 }
 0x1b0   :  { %v438_v33 = vpop.f32.mrf.mxu1 }
 0x1ba   :  { %v484_v34 = vpop.eup %483 }
 0x1bb   :  { %v222_v35 = vpack.c.bf16 %v484_v34, %v484_v34 }
 0x1bd   :  { %456 = vmatmul.mubr.bf16.vlgmr.msra.gmra.mxu0 %v222_v35 }
 0x27d   :  { %v328_v39 = vpop.f32.mrf.mxu0 }
 0x27e   :  { %v329_v40 = vadd.f32 %v380_v38, %v328_v39 }
 0x27f   :  { %v457_v41 = vpop.f32.mrf.mxu0 }
 0x280   :  { %v342_v42 = vsel %vm338_vm4, %v329_v40, 0.0 }
 0x281   :  { %v331_v43 = vpop.f32.mrf.mxu0  ;;  %v343_v44 = vsel %vm64_vm1, %v342_v42, 0.0 }
 0x282   :  { %344 = vadd.xlane.f32.xlu0 %v343_v44 }
 0x283   :  { %v458_v45 = vpop.f32.mrf.mxu0 }
 0x30b   :  { %v345_v46 = vpop.xlane.xlu0 %344 }
 0x30c   :  { %v346_v47 = vsub.f32 0.0, %v345_v46 }
 0x30e   :  { %v389_v48 = vadd.f32 -7.351508, %v346_v47 }
 0x310   :  { %v350_v49 = vsel %vm339_vm5, %v389_v48, %v329_v40 }
 0x311   :  { %351 = vst.msk [vmem:[#allocation5] sm:$0xff] %vm64_vm1, %v350_v49 }
 0x312   :  { %516 = shalt.err (!%p513_p9)
}
 0x313   :  { %361 = dma.vmem_to_hbm [thread:$0]  %s359_s18, 128, %s676_s7, [#allocation4]  }
 0x314   :  { %527 = dma.done.wait [#allocation4], 128  }
 0x315   :  { %528 = vsyncadd [#allocation4], 4294967168 }
 0x316   :  { %365 = vsyncpa [#allocation3], 1 }
 0x317   :  { %366 = vsyncpa [#allocation4], 1 }

</bundles_post_ra>
